<compile_context>
chip_gen: v7x
topology: tpu7x:2x2x1
jax: 0.10.0
libtpu: 0.0.40
codegen_flags: <defaults>
</compile_context>

<pallas_src>
import math

import jax
import jax.numpy as jnp
from jax.experimental import pallas as pl
from jax.experimental.pallas import tpu as pltpu


def _cdiv(a: int, b: int) -> int:
    return (a + b - 1) // b


def _round_up(a: int, b: int) -> int:
    return _cdiv(a, b) * b


# ----------------------------------------------------------------------------- init-time buffer
def make_pos_embedding(emb_size: int, maxlen: int = 5000, dtype=jnp.float32):
    """Mirrors the PyTorch __init__ (register_buffer 'pos_embedding', without the leading
    unsqueeze(0); broadcasting over batch is done inside the kernel).
    Store in bf16 here if the surrounding model is bf16 (halves DMA bytes)."""
    den = jnp.exp(-jnp.arange(0, emb_size, 2, dtype=jnp.float32) * math.log(10000.0) / emb_size)
    pos = jnp.arange(0, maxlen, dtype=jnp.float32).reshape(maxlen, 1)
    pe = jnp.zeros((maxlen, emb_size), jnp.float32)
    pe = pe.at[:, 0::2].set(jnp.sin(pos * den))
    pe = pe.at[:, 1::2].set(jnp.cos(pos * den))
    return pe.astype(dtype)


# ----------------------------------------------------------------------------- kernel
def _pos_enc_kernel(x_ref, pe_ref, o_ref):
    # x_ref: (bt, ts, E), pe_ref: (ts, E) -> broadcast add over the batch-tile dim.
    # Dropout is identity in eval mode.
    # TODO(synk): training-mode dropout (nn.Dropout RNG mask) not implemented; eval semantics only.
    o_ref[...] = (x_ref[...] + pe_ref[...]).astype(o_ref.dtype)


# ----------------------------------------------------------------------------- tiling heuristics
_TARGET_BLOCK_BYTES = 4 * 1024 * 1024  # ~4 MiB per activation block (v7x-friendly)


def _choose_tiles(B: int, S: int, E: int, itemsize: int):
    """Byte-budget-aware (batch_tile, seq_tile).

    Targets ~4 MiB per activation block so the total double-buffered footprint
    (2 x in + 2 x out + 2 x pe) stays <= ~24 MiB (safe under v7x's 64 MiB VMEM),
    while keeping blocks large enough that the ~0.35 us per-grid-step overhead
    amortizes at v7x's ~3.2 TB/s HBM bandwidth.
    """
    S8 = _round_up(S, 8)          # seq tile must be a multiple of 8 (sublane rule)
    row_bytes = E * itemsize      # bytes per (batch element, sequence row)

    # First choice: fold the whole batch into every block (fewest grid steps).
    bt = B
    ts = max(8, min(S8, (_TARGET_BLOCK_BYTES // max(1, bt * row_bytes)) // 8 * 8))
    if bt * ts * row_bytes > _TARGET_BLOCK_BYTES:
        # Whole batch too large even at the minimum seq tile: tile the batch instead.
        ts = 8
        bt = max(1, _TARGET_BLOCK_BYTES // (ts * row_bytes))

    # Keep >= 2 grid steps when possible so both v7x TensorCores get work
    # (harmless on single-core v5e/v6e).
    if _cdiv(S, ts) * _cdiv(B, bt) == 1 and B > 1:
        bt = _cdiv(B, 2)

    return bt, ts


# ----------------------------------------------------------------------------- forward
def positional_encoding_forward(token_embedding, pos_embedding):
    """token_embedding: (B, S, E); pos_embedding: (maxlen, E) with maxlen >= S."""
    B, S, E = token_embedding.shape
    maxlen, E_pe = pos_embedding.shape
    assert E_pe == E and maxlen >= S

    itemsize = jnp.dtype(token_embedding.dtype).itemsize
    pe_itemsize = jnp.dtype(pos_embedding.dtype).itemsize

    bt, ts = _choose_tiles(B, S, E, itemsize)
    num_s = _cdiv(S, ts)
    num_b = _cdiv(B, bt)

    # Double-buffered footprint estimate -> explicit scoped-VMEM limit (v5e default is
    # only 16 MiB; v6e/v7x default 32 MiB).  Cap at 48 MiB to stay under v7x's 64 MiB.
    x_block_bytes = bt * ts * E * itemsize
    pe_block_bytes = ts * E * pe_itemsize
    footprint = 2 * (2 * x_block_bytes + pe_block_bytes)
    vmem_limit = int(min(48 * 1024 * 1024, max(32 * 1024 * 1024, 2 * footprint)))

    return pl.pallas_call(
        _pos_enc_kernel,
        out_shape=jax.ShapeDtypeStruct((B, S, E), token_embedding.dtype),
        # Seq-tile axis outer, batch-tile axis inner: pe block index depends only on the
        # seq tile, so the auto-pipeline skips redundant DMAs of the table across batch
        # tiles.  Both axes are independent -> fully parallel for megacore sharding.
        grid=(num_s, num_b),
        in_specs=[
            pl.BlockSpec((bt, ts, E), lambda s, b: (b, s, 0)),  # activations
            # Full table passed in; index_map alone restricts reads to the first
            # ceil(S/ts) tiles (no wrapper-side [:S] slice / extra HBM copy).
            pl.BlockSpec((ts, E), lambda s, b: (s, 0)),
        ],
        out_specs=pl.BlockSpec((bt, ts, E), lambda s, b: (b, s, 0)),
        compiler_params=pltpu.CompilerParams(
            dimension_semantics=("parallel", "parallel"),
            vmem_limit_bytes=vmem_limit,
        ),
    )(token_embedding, pos_embedding)


# ----------------------------------------------------------------------------- main
if __name__ == "__main__":
    key = jax.random.PRNGKey(0)

    # Small shapes consistent with the module's forward: (batch, seq, emb_size).
    batch, seq_len, emb_size = 2, 8, 256   # emb_size multiple of 128 -> lane-dense stores
    maxlen = 64                            # module default is 5000; forward only reads [:seq]
    dropout_p = 0.1                        # identity in eval mode

    pos_embedding = make_pos_embedding(emb_size, maxlen)
    token_embedding = jax.random.normal(key, (batch, seq_len, emb_size), jnp.float32)

    fwd = jax.jit(positional_encoding_forward)
    out = fwd(token_embedding, pos_embedding)
    jax.block_until_ready(out)

    # Pure-JAX reference check of the forward semantics (eval mode).
    ref = token_embedding + pos_embedding[None, :seq_len, :]
    assert out.shape == (batch, seq_len, emb_size)
    assert jnp.allclose(out, ref, atol=1e-6, rtol=1e-6)
    print("KERNEL_OK")
</pallas_src>

<mosaic_0001>
module attributes {stable_mosaic.version = 11 : i64} {
  func.func @_pos_enc_kernel(%arg0: i32, %arg1: i32, %arg2: memref<1x8x256xf32, #tpu.memory_space<vmem>>, %arg3: memref<8x256xf32, #tpu.memory_space<vmem>>, %arg4: memref<1x8x256xf32, #tpu.memory_space<vmem>>) attributes {dimension_semantics = [#tpu.dimension_semantics<parallel>, #tpu.dimension_semantics<parallel>], iteration_bounds = array<i64: 1, 2>, scalar_prefetch = 0 : i64, scratch_operands = 0 : i64, tpu.core_type = #tpu.core_type<tc>, window_params = [{transform_indices = @transform_0, window_bounds = array<i64: 1, 8, 256>}, {transform_indices = @transform_1, window_bounds = array<i64: 8, 256>}, {transform_indices = @transform_2, window_bounds = array<i64: 1, 8, 256>}]} {
    %c0 = arith.constant 0 : index
    %c0_0 = arith.constant 0 : index
    %c0_1 = arith.constant 0 : index
    %0 = vector.load %arg2[%c0, %c0_0, %c0_1] : memref<1x8x256xf32, #tpu.memory_space<vmem>>, vector<1x8x256xf32>
    %c0_2 = arith.constant 0 : index
    %c0_3 = arith.constant 0 : index
    %1 = vector.load %arg3[%c0_2, %c0_3] : memref<8x256xf32, #tpu.memory_space<vmem>>, vector<8x256xf32>
    %2 = vector.shape_cast %1 : vector<8x256xf32> to vector<1x8x256xf32>
    %3 = arith.addf %0, %2 : vector<1x8x256xf32>
    %c0_4 = arith.constant 0 : index
    %c0_5 = arith.constant 0 : index
    %c0_6 = arith.constant 0 : index
    %4 = vector.load %arg4[%c0_4, %c0_5, %c0_6] : memref<1x8x256xf32, #tpu.memory_space<vmem>>, vector<1x8x256xf32>
    tpu.vector_store %arg4[%c0_4, %c0_5, %c0_6], %3 {strides = array<i32>} : memref<1x8x256xf32, #tpu.memory_space<vmem>>, vector<1x8x256xf32>,
    return
  }
  func.func @transform_0(%arg0: i32, %arg1: i32) -> (i32, i32, i32) {
    %c0_i32 = arith.constant 0 : i32
    %c0_i32_0 = arith.constant 0 : i32
    return %arg1, %arg0, %c0_i32 : i32, i32, i32
  }
  func.func @transform_1(%arg0: i32, %arg1: i32) -> (i32, i32) {
    %c0_i32 = arith.constant 0 : i32
    %c0_i32_0 = arith.constant 0 : i32
    return %arg0, %c0_i32 : i32, i32
  }
  func.func @transform_2(%arg0: i32, %arg1: i32) -> (i32, i32, i32) {
    %c0_i32 = arith.constant 0 : i32
    %c0_i32_0 = arith.constant 0 : i32
    return %arg1, %arg0, %c0_i32 : i32, i32, i32
  }
}

</mosaic_0001>

<bundles_post_ra>
// kernel: positional_encoding_forward.1
= control target key start
LH: loop header
LB: loop body
LE: loop exit
PB: predicated region body
PF: predicated region fallthrough
CT: control target
= control target key end

     0   :  { %7 = vsyncpa [#allocation3], 0  ;;  %s795_s0 = inlined_call_operand.hbm [shape: f32[2,8,256], index: 0, kind: input, shape index: {}]   ;;  %s796_s1 = inlined_call_operand.hbm [shape: f32[64,256], index: 1, kind: input, shape index: {}]   ;;  %s797_s2 = inlined_call_operand.hbm [shape: f32[2,8,256], index: 2, kind: output, shape index: {}]  }
   0x1   :  { %9 = vsyncpa [#allocation3 + $0x1], 0 }
   0x2   :  { %10 = vsyncpa [#allocation6], 0 }
   0x3   :  { %11 = vsyncpa [#allocation4], 0 }
   0x4   :  { %13 = vsyncpa [#allocation4 + $0x1], 0  ;;  %s576_s9 = smov 0   ;;  %s578_s10 = smov 0  }
   0x5   :  { %s580_s11 = smov 0   ;;  %s582_s12 = smov 0  }
   0x6   :  { %s584_s13 = smov 0   ;;  %s586_s14 = smov 0  }
   0x7 LB: > { %s320_s15 = sadd.s32 4294967295, %s556_s14   ;;  %s321_s16 = sadd.s32 4294967294, %s556_s14   ;;  %s556_s14 = sphi %s586_s14, %s19_s14   ;;  %s552_s13 = sphi %s584_s13, %s822_s13   ;;  %s548_s12 = sphi %s582_s12, %s821_s12   ;;  %s544_s11 = sphi %s580_s11, %s820_s11   ;;  %s540_s10 = sphi %s578_s10, %s819_s10   ;;  %s536_s9 = sphi %s576_s9, %s818_s9  }
   0x8   : > { %p53_p0 = scmp.ne.s32.totalorder %s540_s10, %s536_s9  ;;  %p610_p1 = scmp.eq.s32.totalorder %s320_s15, 0 }
   0x9   : > { %p614_p2 = scmp.eq.s32.totalorder %s320_s15, 1  ;;  %p111_p3 = scmp.eq.s32.totalorder %s321_s16, 1 }
   0xa   : > { %s802_s17 = scalar_select %p610_p1, 1, 0 }
   0xb   : > { %s803_s18 = scalar_select %p614_p2, 1, 0 }
   0xc   : > { %p620_p4 = por %p610_p1, %p53_p0  ;;  %p322_p5 = scmp.ge.s32.totalorder %s556_s14, 1 }
   0xd   : > { %p625_p6 = por %p111_p3, %p53_p0  ;;  %p118_p7 = scmp.lt.s32.totalorder %s556_s14, 3 }
   0xe   : > { %s804_s19 = scalar_select %p620_p4, 1, 0 }
   0xf   : > { %s805_s20 = scalar_select %p625_p6, 1, 0 }
  0x10   : > { %p630_p8 = pnand %p322_p5, %p118_p7  ;;  %s558_s22 = smov [#allocation5]  }
  0x11   : > { %s134_s23 = sshll.u32 %s558_s22, 4  ;;  %s28_s25 = sadd.s32 1, %s552_s13  ;;  %s135_s23 = int_to_ptr.vmem [resolvable:$true] %s134_s23 }
  0x12   : > { %s806_s21 = scalar_select %p630_p8, 1, 0 }
  0x13   : > { %p347_p10 = pneg %p630_p8  ;;  %s40_s26 = sadd.s32 1, %s544_s11 }
  0x14   : > { %p645_p12 = scmp.ge.s32.totalorder %s28_s25, 2  ;;  %s412_s30 = scalar_lea.hbm %s796_s1, 256 }
  0x15   : > { %p639_p11 = pnand %p347_p10, %p610_p1  ;;  %p413_p13 = scmp.ne.s32.totalorder %s796_s1, %s412_s30 }
  0x16   : > { %s808_s27 = scalar_select %p645_p12, 1, 0 }
  0x17   : > { %p414_p0 = pneg %p639_p11  ;;  %s417_s7 = scalar_lea.hbm %s796_s1, 2048 }
  0x18   : > { %p418_p7 = scmp.lt.u32.totalorder %s417_s7, %s412_s30  ;;  %p419_p10 = scmp.lt.u32.totalorder %s412_s30, %s796_s1 }
  0x19   : > { %p415_p3 = pnand %p414_p0, %p413_p13 }
  0x1a   : > { %p420_p9 = por %p419_p10, %p418_p7 }
  0x1b   : > { %p416_p5 = pneg %p415_p3 }
  0x1d   : > { %p421_p6 = pnand %p420_p9, %p416_p5 }
  0x1f   : > { %424 = shalt.err (!%p421_p6)
}
  0x20   : > { %s425_s16 = scalar_lea.vmem %s135_s23, 256  ;;  %p433_p2 = scmp.lt.s32.totalorder %s135_s23, %s135_s23 }
  0x21   : > { %p426_p1 = scmp.ne.s32.totalorder %s135_s23, %s425_s16  ;;  %p434_p12 = scmp.lt.s32.totalorder %s425_s16, %s425_s16 }
  0x23   : > { %p428_p4 = pnand %p426_p1, %p414_p0  ;;  %p435_p13 = por %p434_p12, %p433_p2 }
  0x25   : > { %p429_p8 = pneg %p428_p4 }
  0x27   : > { %p436_p3 = pnand %p435_p13, %p429_p8 }
  0x29   : > { %439 = shalt.err (!%p436_p3)
}
  0x2a   : > { %350 = dma.hbm_to_vmem [thread:$0]  (!%p639_p11), %s796_s1, 256, %s135_s23, [#allocation6]  }
  0x2b   : > { %p809_p1 = scmp.ne.s32.totalorder %s808_s27, 0  ;;  %p47_p2 = scmp.ne.s32.totalorder %s544_s11, %s540_s10 }
  0x2c   : > { %p48_p4 = scmp.eq.s32.totalorder %s556_s14, 0  ;;  %p360_p6 = scmp.lt.s32.totalorder %s556_s14, 2 }
  0x2d   : > { %s824_s25 = smov (%p809_p1, %s28_s25), 0  ;;  %p810_p12 = scmp.ne.s32.totalorder %s803_s18, 0 }
  0x2e   : > { %s35_s24 = ssub.s32 %s552_s13, %s824_s25  ;;  %p49_p9 = por %p48_p4, %p47_p2 }
  0x2f   : > { %p38_p8 = scmp.eq.s32.totalorder %s35_s24, 0  ;;  %p680_p0 = por %p810_p12, %p47_p2 }
  0x30   : > { %s145_s30 = sand.u32 1, %s544_s11   ;;  %s337_s27 = sshll.u32 %s552_s13, 8 }
  0x31   : > { %s688_s3 = scalar_select %p38_p8, %s544_s11, %s40_s26  }
  0x32   : > { %s325_s23 = sshll.u32 %s145_s30, 4  ;;  %s694_s6 = scalar_lea.hbm %s795_s0, %s337_s27 }
  0x33   : > { %s149_s18 = scalar_lea.vmem [#allocation2], %s325_s23  ;;  %p698_p11 = pnand %p360_p6, %p49_p9 }
  0x34   : > { %s159_s7 = sshll.u32 %s149_s18, 4  ;;  %s146_s26 = scalar_lea.sflag [#allocation3], %s145_s30  ;;  %s696_s7 = int_to_ptr.vmem [resolvable:$true] %s159_s7 }
  0x35   : > { %s440_s15 = scalar_lea.hbm %s694_s6, 256  ;;  %p442_p7 = pneg %p698_p11 }
  0x36   : > { %p441_p5 = scmp.ne.s32.totalorder %s694_s6, %s440_s15  ;;  %s445_s28 = scalar_lea.hbm %s795_s0, 512 }
  0x37   : > { %p446_p3 = scmp.lt.u32.totalorder %s694_s6, %s795_s0  ;;  %p447_p1 = scmp.lt.u32.totalorder %s445_s28, %s440_s15 }
  0x38   : > { %p443_p10 = pnand %p442_p7, %p441_p5  ;;  %p449_p4 = scmp.lt.u32.totalorder %s440_s15, %s694_s6 }
  0x39   : > { %p448_p2 = por %p447_p1, %p446_p3 }
  0x3a   : > { %p444_p13 = pneg %p443_p10 }
  0x3b   : > { %p450_p6 = por %p449_p4, %p448_p2 }
  0x3d   : > { %p451_p8 = pnand %p450_p6, %p444_p13 }
  0x3f   : > { %454 = shalt.err (!%p451_p8)
}
  0x40   : > { %s455_s30 = scalar_lea.vmem %s696_s7, 256  ;;  %s559_s27 = smov [#allocation2]  }
  0x41   : > { %p456_p9 = scmp.ne.s32.totalorder %s696_s7, %s455_s30  ;;  %s460_s4 = sshll.u32 %s559_s27, 4  ;;  %s461_s4 = int_to_ptr.vmem [resolvable:$false] %s460_s4 }
  0x42   : > { %s462_s5 = scalar_lea.vmem %s461_s4, 512  ;;  %p463_p10 = scmp.lt.s32.totalorder %s696_s7, %s461_s4 }
  0x43   : > { %p458_p12 = pnand %p456_p9, %p442_p7  ;;  %p464_p3 = scmp.lt.s32.totalorder %s462_s5, %s455_s30 }
  0x45   : > { %p459_p5 = pneg %p458_p12  ;;  %p465_p1 = por %p464_p3, %p463_p10 }
  0x47   : > { %p466_p2 = pnand %p465_p1, %p459_p5 }
  0x49   : > { %469 = shalt.err (!%p466_p2)
}
  0x4a   : > { %354 = dma.hbm_to_vmem [thread:$0]  (!%p698_p11), %s694_s6, 256, %s696_s7, %s146_s26  }
  0x4b   : > { %p813_p13 = scmp.ne.s32.totalorder %s806_s21, 0 }
  0x4c   : > { %s730_s18 = sand.u32 (!%p813_p13), 1, %s540_s10   ;;  %p814_p7 = scmp.ne.s32.totalorder (!%p813_p13), %s804_s19, 0 }
  0x4d   : > { %168 = sbr.rel (%p813_p13) target bundleno = 113 (0x71), region = 28  ;;  %s329_s15 = sshll.u32 (!%p813_p13), %s730_s18, 4 }
  0x4e   : > { %s171_s16 = scalar_lea.sflag (!%p813_p13), [#allocation3], %s730_s18  ;;  %s174_s22 = scalar_lea.vmem (!%p813_p13), [#allocation2], %s329_s15 }
  0x54   : > { %523 = dma.done.wait (%p814_p7), %s171_s16, 256  }
  0x55   : > { %525 = vsyncadd (%p814_p7), %s171_s16, 4294967040  ;;  %p815_p4 = scmp.ne.s32.totalorder %s802_s17, 0 }
  0x57   : > { %527 = dma.done.wait (%p815_p4), [#allocation6], 256  }
  0x58   : > { %529 = vsyncadd (%p815_p4), [#allocation6], 4294967040  ;;  %s198_s21 = scalar_lea.vmem [#allocation7], %s329_s15  ;;  %s338_s7 = sshll.u32 %s548_s12, 8  ;;  %v199_v0 = vld [vmem:[%s174_s22] sm:$0xff]  ;;  %v200_v2 = vld [vmem:[%s174_s22 + $0x8] sm:$0xff] }
  0x59   : > { %s224_s6 = sshll.u32 %s198_s21, 4  ;;  %v201_v1 = vld [vmem:[#allocation5] sm:$0xff]  ;;  %v202_v4 = vld [vmem:[#allocation5 + $0x8] sm:$0xff]  ;;  %s748_s8 = scalar_lea.hbm %s797_s2, %s338_s7  ;;  %s743_s6 = int_to_ptr.vmem [resolvable:$true] %s224_s6 }
  0x5a   : > { %v203_v3 = vadd.f32 %v201_v1, %v199_v0  ;;  %v204_v5 = vadd.f32 %v202_v4, %v200_v2  ;;  %s208_s26 = scalar_lea.sflag [#allocation4], %s730_s18  ;;  %s470_s12 = scalar_lea.vmem %s743_s6, 256 }
  0x5b   : > { %p471_p11 = scmp.ne.s32.totalorder %s743_s6, %s470_s12  ;;  %s560_s28 = smov [#allocation7]  }
  0x5c   : > { %205 = vst [vmem:[%s198_s21] sm:$0xff] %v203_v3  ;;  %206 = vst [vmem:[%s198_s21 + $0x8] sm:$0xff] %v204_v5  ;;  %s474_s24 = sshll.u32 %s560_s28, 4  ;;  %s475_s24 = int_to_ptr.vmem [resolvable:$false] %s474_s24 }
  0x5d   : > { %p472_p6 = pnand %p471_p11, %p680_p0  ;;  %s476_s23 = scalar_lea.vmem %s475_s24, 512 }
  0x5e   : > { %p477_p9 = scmp.lt.s32.totalorder %s743_s6, %s475_s24  ;;  %p478_p12 = scmp.lt.s32.totalorder %s476_s23, %s470_s12 }
  0x5f   : > { %p473_p8 = pneg %p472_p6 }
  0x60   : > { %p479_p5 = por %p478_p12, %p477_p9 }
  0x62   : > { %p480_p10 = pnand %p479_p5, %p473_p8 }
  0x64   : > { %483 = shalt.err (!%p480_p10)
}
  0x65   : > { %s484_s30 = scalar_lea.hbm %s748_s8, 256  ;;  %s488_s5 = scalar_lea.hbm %s797_s2, 512 }
  0x66   : > { %p485_p3 = scmp.ne.s32.totalorder %s748_s8, %s484_s30  ;;  %p489_p13 = scmp.lt.u32.totalorder %s748_s8, %s797_s2 }
  0x67   : > { %p490_p7 = scmp.lt.u32.totalorder %s488_s5, %s484_s30  ;;  %p492_p11 = scmp.lt.u32.totalorder %s484_s30, %s748_s8 }
  0x68   : > { %p486_p1 = pnand %p485_p3, %p680_p0 }
  0x69   : > { %p491_p4 = por %p490_p7, %p489_p13 }
  0x6a   : > { %p487_p2 = pneg %p486_p1 }
  0x6b   : > { %p493_p6 = por %p492_p11, %p491_p4 }
  0x6d   : > { %p494_p8 = pnand %p493_p6, %p487_p2 }
  0x6f   : > { %497 = shalt.err (!%p494_p8)
}
  0x70   : > { %345 = dma.vmem_to_hbm [thread:$0]  (%p680_p0), %s743_s6, 256, %s748_s8, %s208_s26  }
  0x71 PF: > { %s236_s16 = sand.u32 1, %s536_s9   ;;  %p816_p9 = scmp.ne.s32.totalorder %s805_s20, 0 }
  0x72   : > { %p817_p12 = scmp.ge.s32.totalorder %s556_s14, 2  ;;  %s237_s22 = scalar_lea.sflag [#allocation4], %s236_s16 }
  0x74   : > { %p356_p5 = pnand %p817_p12, %p816_p9 }
  0x76   : > { %531 = dma.done.wait (!%p356_p5), %s237_s22, 256  }
  0x77   : > { %533 = vsyncadd (!%p356_p5), %s237_s22, 4294967040  ;;  %s19_s14 = sadd.s32 1, %s556_s14   ;;  %s818_s9 = smov %s540_s10 }
  0x78   : > { %p16_p10 = scmp.ge.s32.totalorder %s19_s14, 4   ;;  %s819_s10 = smov %s544_s11 }
  0x79   : > { %s820_s11 = smov %s688_s3  ;;  %s821_s12 = smov %s552_s13 }
  0x7a   : > { %s822_s13 = smov %s824_s25  ;;  %18 = sbr.rel (!%p16_p10) target bundleno = 7 (0x7), region = 78 }
  0x81   :  { %242 = vsyncpa [#allocation3], 1 }
  0x82   :  { %244 = vsyncpa [#allocation3 + $0x1], 1 }
  0x83   :  { %245 = vsyncpa [#allocation6], 1 }
  0x84   :  { %246 = vsyncpa [#allocation4], 1 }
  0x85   :  { %248 = vsyncpa [#allocation4 + $0x1], 1 }

</bundles_post_ra>
